<compile_context>
chip_gen: v7x
topology: tpu7x:2x2x1
jax: 0.10.0
libtpu: 0.0.40
codegen_flags: <defaults>
</compile_context>

<pallas_src>
import jax
import jax.numpy as jnp
from jax import lax
from jax.experimental import pallas as pl
from jax.experimental.pallas import tpu as pltpu

_LANE = 128
_SUBLANE = 8


def _round_up(x, m):
    return ((x + m - 1) // m) * m


def _vmem_capacity_bytes():
    try:
        return int(pltpu.get_tpu_info().vmem_capacity_bytes)
    except Exception:
        return 128 << 20  # v5e/v6e physical VMEM as a safe fallback


def _default_target_bytes(vmem_cap):
    # ~16 MiB blocks on 128 MiB-VMEM chips (v5e/v6e), ~8 MiB on 64 MiB (v7x):
    # large enough to amortize the ~0.35 us per-grid-step overhead against the
    # HBM stream, small enough that double-buffering stays well inside VMEM.
    return int(max(min(vmem_cap // 8, 32 << 20), 4 << 20))


def _choose_blocks(B, C, L, itemsize, target_bytes):
    """Pick (bB, bC, bL) so each padded input block stays ~<= target_bytes."""

    def blk_bytes(bB, bC, bL):
        # Padded VMEM footprint of one input block in the *input* dtype.
        return bB * max(bC, _SUBLANE) * _round_up(bL, _LANE) * itemsize

    # Minimum legal batch tile: full B if B < 8, else 8 (keeps the output
    # block's sublane dim 8-aligned -> no masked stores on that axis).
    bB_min = B if B < _SUBLANE else _SUBLANE

    # Channel tile: full C, or halve while still a multiple of 128 and the
    # minimum-batch block is over budget. Halved values always divide C, so
    # channel blocks are never partial and output stores stay lane-dense.
    bC = C
    while bC > _LANE and bC % (2 * _LANE) == 0 and blk_bytes(bB_min, bC, L) > target_bytes:
        bC //= 2

    # Spatial (reduction) tile: full L unless even the shrunken block is over
    # budget; then a 512-lane multiple (keeps bL % 128 == 0 so the hot loop
    # accumulates 128-lane sub-tiles with pure VPU adds; tail masked on the
    # last step only).
    bL = L
    if blk_bytes(bB_min, bC, L) > target_bytes and L > 4 * _LANE:
        bL = 4 * _LANE
        while bL * 2 <= L and blk_bytes(bB_min, bC, bL * 2) <= target_bytes:
            bL *= 2

    # Batch tile: grow in powers of two (multiples of 8) within budget.
    bB = bB_min
    while bB * 2 <= B and blk_bytes(bB * 2, bC, bL) <= target_bytes:
        bB *= 2

    # Guarantee >= 2 tiles across the parallel (batch, channel) axes so a
    # 2-TensorCore chip (v7x) can shard them; neutral on single-TC chips.
    def _parallel_tiles(bB_, bC_):
        return pl.cdiv(B, bB_) * (C // bC_)

    while _parallel_tiles(bB, bC) < 2:
        if bC > _LANE and bC % (2 * _LANE) == 0:
            bC //= 2
        elif bB > bB_min:
            bB //= 2
        else:
            break

    return bB, bC, bL


def _make_pow_fn(p):
    pf = float(p)
    if pf.is_integer() and pf >= 1.0:
        n = int(pf)

        def pow_fn(x):  # exact repeated multiply; matches torch.pow for int p
            y = x
            for _ in range(n - 1):
                y = y * x
            return y
    elif (2.0 * pf).is_integer() and pf > 0.0:
        n = int(pf)  # floor(p) for positive half-integer p

        def pow_fn(x):  # x >= 0 (post-ReLU features): x**p = x**floor(p) * sqrt(x)
            y = jnp.sqrt(x)
            for _ in range(n):
                y = y * x
            return y
    else:

        def pow_fn(x):
            # TODO(synk): generic non-integer p is EUP-bound (log+exp per element).
            return jnp.power(x, jnp.float32(pf))

    return pow_fn


def _make_single_block_kernel(p, eps, L_total):
    """Whole spatial extent fits in one block: scratch-free one-shot kernel."""
    pow_fn = _make_pow_fn(p)
    inv_p = 1.0 / float(p)
    inv_L = 1.0 / float(L_total)

    def kernel(x_ref, o_ref):
        x = x_ref[...].astype(jnp.float32)                 # (bB, bC, L)
        xp = pow_fn(x)
        m = jnp.sum(xp, axis=-1) * jnp.float32(inv_L)      # (bB, bC)
        o_ref[...] = jnp.power(m + jnp.float32(eps),
                               jnp.float32(inv_p)).astype(o_ref.dtype)

    return kernel


def _make_streaming_kernel(p, eps, L_total, bL, nk):
    """Spatial reduction tiled over nk grid steps (bL % 128 == 0 guaranteed)."""
    pow_fn = _make_pow_fn(p)
    inv_p = 1.0 / float(p)
    inv_L = 1.0 / float(L_total)
    n_lane_tiles = bL // _LANE
    tail = L_total - (nk - 1) * bL          # valid elements in the last k block
    mask_needed = (tail != bL)

    def kernel(x_ref, o_ref, acc_ref):
        k = pl.program_id(2)
        last = nk - 1

        @pl.when(k == 0)
        def _():
            acc_ref[...] = jnp.zeros_like(acc_ref)

        def accumulate(masked):
            x = x_ref[...].astype(jnp.float32)              # (bB, bC, bL)
            if masked:
                # Mask the *inputs* so padded-tail garbage can't produce NaN
                # (and x**p of it is never computed into the accumulator).
                pos = lax.broadcasted_iota(jnp.int32, x.shape, 2)
                x = jnp.where(pos < tail, x, jnp.float32(0.0))
            xp = pow_fn(x)
            # Lane-shaped accumulation: pure VPU adds of 128-lane sub-tiles.
            # The single cross-lane reduce + relayout happens in the finalize.
            partial = xp[:, :, 0:_LANE]
            for j in range(1, n_lane_tiles):
                partial = partial + xp[:, :, j * _LANE:(j + 1) * _LANE]
            acc_ref[...] += partial

        if mask_needed:
            @pl.when(k < last)
            def _():
                accumulate(masked=False)

            @pl.when(k == last)
            def _():
                accumulate(masked=True)
        else:
            accumulate(masked=False)

        @pl.when(k == last)
        def _():
            m = jnp.sum(acc_ref[...], axis=-1) * jnp.float32(inv_L)
            o_ref[...] = jnp.power(m + jnp.float32(eps),
                                   jnp.float32(inv_p)).astype(o_ref.dtype)

    return kernel


def gemp(x, p: float = 3.0, eps: float = 1e-12, out_dtype=None, target_bytes=None):
    """GeMP forward. x: (B, C, H, W), (B, C, L) or (B, F)."""
    orig_2d = (x.ndim == 2)
    if orig_2d:
        # (1, B, F): batch rides the sublane dim instead of a padded singleton.
        x3 = x[None, :, :]
    else:
        x3 = x.reshape(x.shape[0], x.shape[1], -1)          # (B, C, L)

    B, C, L = x3.shape
    if out_dtype is None:
        out_dtype = x.dtype

    vmem_cap = _vmem_capacity_bytes()
    if target_bytes is None:
        target_bytes = _default_target_bytes(vmem_cap)

    itemsize = jnp.dtype(x3.dtype).itemsize
    bB, bC, bL = _choose_blocks(B, C, L, itemsize, target_bytes)
    nb, nc, nk = pl.cdiv(B, bB), C // bC, pl.cdiv(L, bL)

    # VMEM budget: double-buffered input blocks + f32 lane accumulator +
    # (tiny) double-buffered output blocks + compiler headroom, capped at 3/4
    # of physical VMEM (~96 MiB v5e/v6e, ~48 MiB v7x). No full-block f32 copy
    # exists: the elementwise + reduce work streams through vregs.
    in_block = bB * max(bC, _SUBLANE) * _round_up(bL, _LANE) * itemsize
    acc_block = (bB * max(bC, _SUBLANE) * _LANE * 4) if nk > 1 else 0
    out_block = 2 * bB * max(bC, _LANE) * max(jnp.dtype(out_dtype).itemsize, 4)
    vmem_limit = int(min(max(2 * in_block + acc_block + out_block + (8 << 20),
                             32 << 20),
                         vmem_cap * 3 // 4))

    if nk == 1:
        kernel = _make_single_block_kernel(p, eps, L)
        scratch = []
    else:
        kernel = _make_streaming_kernel(p, eps, L, bL, nk)
        scratch = [pltpu.VMEM((bB, bC, _LANE), jnp.float32)]

    out = pl.pallas_call(
        kernel,
        out_shape=jax.ShapeDtypeStruct((B, C), out_dtype),
        grid_spec=pltpu.PrefetchScalarGridSpec(
            num_scalar_prefetch=0,
            grid=(nb, nc, nk),
            in_specs=[pl.BlockSpec((bB, bC, bL), lambda i, j, k: (i, j, k))],
            out_specs=pl.BlockSpec((bB, bC), lambda i, j, k: (i, j)),
            scratch_shapes=scratch,
        ),
        compiler_params=pltpu.CompilerParams(
            dimension_semantics=("parallel", "parallel", "arbitrary"),
            vmem_limit_bytes=vmem_limit,
        ),
    )(x3)

    if orig_2d:
        out = out[0]
    return out


def gemp_ref(x, p: float = 3.0, eps: float = 1e-12):
    """Pure-JAX reference mirroring the PyTorch forward."""
    if x.ndim != 2:
        x = x.reshape(x.shape[0], x.shape[1], -1)
    xf = x.astype(jnp.float32)
    return (jnp.mean(xf ** p, axis=-1) + eps) ** (1.0 / p)


if __name__ == "__main__":
    key = jax.random.PRNGKey(0)
    k1, k2, k3, k4, k5 = jax.random.split(key, 5)

    # 1) Small shape consistent with the module's pooled feature maps.
    #    GeM pooling is applied to non-negative (post-ReLU) feature maps.
    B, C, H, W = 2, 4, 16, 16
    x = jax.random.uniform(k1, (B, C, H, W), dtype=jnp.float32)
    out = jax.block_until_ready(gemp(x, p=3.0, eps=1e-12))
    ref = gemp_ref(x)
    assert out.shape == (B, C), out.shape
    assert jnp.allclose(out.astype(jnp.float32), ref, atol=1e-5, rtol=1e-4), (out, ref)

    # 2) Multi-tile (>=2) parallel grid over batch/channels, single-block L.
    x2 = jax.random.uniform(k2, (16, 512, 14, 14), dtype=jnp.float32)
    out2 = jax.block_until_ready(gemp(x2))
    assert jnp.allclose(out2.astype(jnp.float32), gemp_ref(x2), atol=1e-5, rtol=1e-4)

    # 3) Force the streaming multi-step reduction + masked-tail path with a
    #    deliberately tiny block budget (exercises the lane-shaped accumulator).
    x3 = jax.random.uniform(k3, (8, 256, 36, 36), dtype=jnp.float32)
    out3 = jax.block_until_ready(gemp(x3, target_bytes=1 << 20))
    assert jnp.allclose(out3.astype(jnp.float32), gemp_ref(x3), atol=1e-5, rtol=1e-4)

    # 4) bf16 input/output (block sizing uses the true itemsize).
    x4 = jax.random.uniform(k4, (4, 256, 14, 14), dtype=jnp.float32).astype(jnp.bfloat16)
    out4 = jax.block_until_ready(gemp(x4))
    assert out4.dtype == jnp.bfloat16
    assert jnp.allclose(out4.astype(jnp.float32), gemp_ref(x4), atol=2e-2, rtol=2e-2)

    # 5) 2-D input path: (B, F) -> (B,), batch rides the sublane dimension.
    x5 = jax.random.uniform(k5, (8, 64), dtype=jnp.float32)
    out5 = jax.block_until_ready(gemp(x5))
    assert out5.shape == (8,), out5.shape
    assert jnp.allclose(out5.astype(jnp.float32), gemp_ref(x5), atol=1e-5, rtol=1e-4)

    print("KERNEL_OK")
</pallas_src>

<mosaic_0001>
module attributes {stable_mosaic.version = 11 : i64} {
  func.func @kernel(%arg0: i32, %arg1: i32, %arg2: i32, %arg3: memref<2x4x256xf32, #tpu.memory_space<vmem>>, %arg4: memref<2x4xf32, #tpu.memory_space<vmem>>) attributes {dimension_semantics = [#tpu.dimension_semantics<parallel>, #tpu.dimension_semantics<parallel>, #tpu.dimension_semantics<arbitrary>], iteration_bounds = array<i64: 1, 1, 1>, scalar_prefetch = 0 : i64, scratch_operands = 0 : i64, tpu.core_type = #tpu.core_type<tc>, window_params = [{transform_indices = @transform_0, window_bounds = array<i64: 2, 4, 256>}, {transform_indices = @transform_1, window_bounds = array<i64: 2, 4>}]} {
    %c0 = arith.constant 0 : index
    %c0_0 = arith.constant 0 : index
    %c0_1 = arith.constant 0 : index
    %0 = vector.load %arg3[%c0, %c0_0, %c0_1] : memref<2x4x256xf32, #tpu.memory_space<vmem>>, vector<2x4x256xf32>
    %1 = arith.mulf %0, %0 : vector<2x4x256xf32>
    %2 = arith.mulf %1, %0 : vector<2x4x256xf32>
    %cst = arith.constant dense<0.000000e+00> : vector<2x4xf32>
    %3 = vector.multi_reduction <add>, %2, %cst [2] : vector<2x4x256xf32> to vector<2x4xf32>
    %cst_2 = arith.constant 3.906250e-03 : f32
    %4 = vector.broadcast %cst_2 : f32 to vector<2x4xf32>
    %5 = arith.mulf %3, %4 : vector<2x4xf32>
    %cst_3 = arith.constant 9.99999996E-13 : f32
    %6 = vector.broadcast %cst_3 : f32 to vector<2x4xf32>
    %7 = arith.addf %5, %6 : vector<2x4xf32>
    %cst_4 = arith.constant 0.333333343 : f32
    %8 = vector.broadcast %cst_4 : f32 to vector<2x4xf32>
    %9 = math.powf %7, %8 : vector<2x4xf32>
    %c0_5 = arith.constant 0 : index
    %c0_6 = arith.constant 0 : index
    %10 = vector.load %arg4[%c0_5, %c0_6] : memref<2x4xf32, #tpu.memory_space<vmem>>, vector<2x4xf32>
    tpu.vector_store %arg4[%c0_5, %c0_6], %9 {strides = array<i32>} : memref<2x4xf32, #tpu.memory_space<vmem>>, vector<2x4xf32>,
    return
  }
  func.func @transform_0(%arg0: i32, %arg1: i32, %arg2: i32) -> (i32, i32, i32) {
    %c0_i32 = arith.constant 0 : i32
    return %arg0, %arg1, %arg2 : i32, i32, i32
  }
  func.func @transform_1(%arg0: i32, %arg1: i32, %arg2: i32) -> (i32, i32) {
    %c0_i32 = arith.constant 0 : i32
    return %arg0, %arg1 : i32, i32
  }
}

</mosaic_0001>

<bundles_post_ra>
// kernel: tpu_custom_call.1
= control target key start
LH: loop header
LB: loop body
LE: loop exit
PB: predicated region body
PF: predicated region fallthrough
CT: control target
= control target key end

     0   :  { %6 = vsyncpa [#allocation3], 0  ;;  %s218_s0 = inlined_call_operand.hbm [shape: f32[2,4,256], index: 0, kind: input, shape index: {}]   ;;  %s219_s1 = inlined_call_operand.hbm [shape: f32[2,4], index: 1, kind: output, shape index: {}]  }
   0x1   :  { %7 = vsyncpa [#allocation4], 0  ;;  %s180_s6 = smov [#allocation2]   ;;  %s132_s10 = scalar_lea.hbm %s218_s0, 256 }
   0x2   :  { %s13_s7 = sshll.u32 %s180_s6, 4  ;;  %p133_p0 = scmp.ne.s32.totalorder %s218_s0, %s132_s10  ;;  %s14_s7 = int_to_ptr.vmem [resolvable:$true] %s13_s7 }
   0x3   :  { %p136_p1 = scmp.lt.u32.totalorder %s132_s10, %s218_s0 }
   0x5   :  { %p138_p2 = pnand %p136_p1, %p133_p0 }
   0x7   :  { %141 = shalt.err (!%p138_p2)
}
   0x8   :  { %s142_s15 = scalar_lea.vmem %s14_s7, 256  ;;  %p147_p4 = scmp.lt.s32.totalorder %s14_s7, %s14_s7 }
   0x9   :  { %p143_p3 = scmp.ne.s32.totalorder %s14_s7, %s142_s15  ;;  %p148_p5 = scmp.lt.s32.totalorder %s142_s15, %s142_s15 }
   0xb   :  { %p149_p6 = por %p148_p5, %p147_p4 }
   0xd   :  { %p150_p7 = pnand %p149_p6, %p143_p3 }
   0xf   :  { %153 = shalt.err (!%p150_p7)
}
  0x10   :  { %s181_s16 = smov 128   ;;  %s182_s17 = smov 8  }
  0x11   :  { %19 = dma.hbm_to_vmem [thread:$0]  %s218_s0, 256, %s14_s7, [#allocation3], %s181_s16, %s181_s16, %s182_s17  }
  0x12   :  { %176 = dma.done.wait [#allocation3], 256  }
  0x13   :  { %177 = vsyncadd [#allocation3], 4294967040  ;;  %v23_v0 = vld [vmem:[#allocation2] sm:$0xff]  ;;  %v24_v1 = vld [vmem:[#allocation2 + $0x8] sm:$0xff]  ;;  %vm35_vm0 = vcmask 1043456   ;;  %v54_v28 = vlaneseq  ;;  %s183_s0 = smov [#allocation5]  }
  0x14   :  { %v25_v2 = vmul.f32 %v23_v0, %v23_v0  ;;  %v26_v3 = vmul.f32 %v24_v1, %v24_v1  ;;  %s75_s20 = sshll.u32 %s183_s0, 4  ;;  %vm64_vm11 = vcmask 1041409   ;;  %vm67_vm12 = vcmask 25600   ;;  %s76_s20 = int_to_ptr.vmem [resolvable:$true] %s75_s20 }
  0x15   :  { %v55_v34 = vand.u32 127, %v54_v28  ;;  %v57_v35 = vshrl.u32 %v54_v28, 7  ;;  %s154_s21 = scalar_lea.vmem %s76_s20, 32  ;;  %p159_p9 = scmp.lt.s32.totalorder %s76_s20, %s76_s20 }
  0x16   :  { %v27_v4 = vmul.f32 %v25_v2, %v23_v0  ;;  %v28_v5 = vmul.f32 %v26_v3, %v24_v1  ;;  %p155_p8 = scmp.ne.s32.totalorder %s76_s20, %s154_s21  ;;  %p160_p10 = scmp.lt.s32.totalorder %s154_s21, %s154_s21 }
  0x17   :  { %v58_v41 = vsub.s32 %v55_v34, %v57_v35 }
  0x18   :  { %v31_v6 = vcombine.high %v27_v4, %v27_v4  ;;  %v36_v7 = vsel %vm35_vm0, %v27_v4, 0.0  ;;  %v32_v8 = vcombine.high %v28_v5, %v28_v5  ;;  %v41_v10 = vsel %vm35_vm0, %v28_v5, 0.0  ;;  %p161_p11 = por %p160_p10, %p159_p9 }
  0x1a   :  { %v37_v9 = vsel %vm35_vm0, %v31_v6, 0.0  ;;  %v42_v11 = vsel %vm35_vm0, %v32_v8, 0.0  ;;  %p162_p12 = pnand %p161_p11, %p155_p8 }
  0x1b   :  { %v38_v12 = vadd.f32 %v37_v9, %v36_v7  ;;  %v43_v13 = vadd.f32 %v42_v11, %v41_v10 }
  0x1d   :  { %39 = vadd.xlane.f32.xlu0 %v38_v12 }
  0x21   :  { %44 = vadd.xlane.f32.xlu0 %v43_v13 }
  0xaa   :  { %v40_v14 = vpop.xlane.xlu0 %39 }
  0xab   :  { %v46_v15 = vmul.f32 0.00390625, %v40_v14 }
  0xad   :  { %v48_v16 = vadd.f32 1e-12, %v46_v15 }
  0xae   :  { %v45_v17 = vpop.xlane.xlu0 %44 }
  0xaf   :  { %v86_v18 = vand.u32 2147483647, %v48_v16  ;;  %v47_v19 = vmul.f32 0.00390625, %v45_v17  ;;  %v90_v26 = vand.u32 2147483648, %v48_v16  ;;  %vm85_vm3 = vcmp.lt.f32.partialorder %v48_v16, 0.0 }
  0xb0   :  { %vm84_vm4 = vcmp.eq.f32.partialorder %v48_v16, 0.0 }
  0xb1   :  { %124 = vlog2.f32 %v86_v18  ;;  %v49_v20 = vadd.f32 1e-12, %v47_v19  ;;  %vm94_vm1 = vweird.f32 %v86_v18  ;;  %vm96_vm2 = vcmp.eq.f32.partialorder %v86_v18, 0.0 }
  0xb2   :  { %vm87_vm7 = vcmp.eq.f32.partialorder %v86_v18, inf }
  0xb3   :  { %v104_v21 = vand.u32 2147483647, %v49_v20  ;;  %v108_v31 = vand.u32 2147483648, %v49_v20  ;;  %vm103_vm8 = vcmp.lt.f32.partialorder %v49_v20, 0.0  ;;  %vm102_vm9 = vcmp.eq.f32.partialorder %v49_v20, 0.0 }
  0xb5   :  { %126 = vlog2.f32 %v104_v21  ;;  %vm112_vm5 = vweird.f32 %v104_v21  ;;  %vm114_vm6 = vcmp.eq.f32.partialorder %v104_v21, 0.0  ;;  %vm105_vm10 = vcmp.eq.f32.partialorder %v104_v21, inf }
  0xbb   :  { %v125_v22 = vpop.eup %124 }
  0xbc   :  { %v91_v23 = vmul.f32 0.33333334, %v125_v22 }
  0xbe   :  { %128 = vpow2.f32 %v91_v23 }
  0xbf   :  { %v127_v24 = vpop.eup %126 }
  0xc0   :  { %v109_v25 = vmul.f32 0.33333334, %v127_v24 }
  0xc2   :  { %130 = vpow2.f32 %v109_v25 }
  0xc8   :  { %v129_v27 = vpop.eup %128 }
  0xc9   :  { %v93_v29 = vor.u32 %v129_v27, %v90_v26 }
  0xcb   :  { %v95_v30 = vsel %vm94_vm1, %v48_v16, %v93_v29 }
  0xcc   :  { %v131_v32 = vpop.eup %130  ;;  %v98_v33 = vsel %vm96_vm2, %v90_v26, %v95_v30 }
  0xcd   :  { %v111_v36 = vor.u32 %v131_v32, %v108_v31  ;;  %v99_v37 = vsel %vm85_vm3, nan, %v98_v33 }
  0xce   :  { %v100_v38 = vsel %vm84_vm4, 0.0, %v99_v37 }
  0xcf   :  { %v113_v39 = vsel %vm112_vm5, %v49_v20, %v111_v36  ;;  %v101_v42 = vsel %vm87_vm7, inf, %v100_v38 }
  0xd0   :  { %v116_v40 = vsel %vm114_vm6, %v108_v31, %v113_v39  ;;  %v59_v46 = vrot.slane %v101_v42, %v58_v41 }
  0xd1   :  { %v117_v43 = vsel %vm103_vm8, nan, %v116_v40 }
  0xd2   :  { %v118_v44 = vsel %vm102_vm9, 0.0, %v117_v43 }
  0xd3   :  { %v119_v45 = vsel %vm105_vm10, inf, %v118_v44 }
  0xd4   :  { %v63_v47 = vrot.slane %v119_v45, %v58_v41 }
  0xd6   :  { %v65_v48 = vsel %vm64_vm11, %v63_v47, %v59_v46 }
  0xd7   :  { %68 = vst.msk [vmem:[#allocation5] sm:$0x3] %vm67_vm12, %v65_v48 }
  0xd8   :  { %165 = shalt.err (!%p162_p12)
}
  0xd9   :  { %s166_s24 = scalar_lea.hbm %s219_s1, 32 }
  0xda   :  { %p167_p13 = scmp.ne.s32.totalorder %s219_s1, %s166_s24  ;;  %p170_p0 = scmp.lt.u32.totalorder %s166_s24, %s219_s1 }
  0xdc   :  { %p172_p1 = pnand %p170_p0, %p167_p13 }
  0xde   :  { %175 = shalt.err (!%p172_p1)
}
  0xdf   :  { %78 = dma.vmem_to_hbm [thread:$0]  %s76_s20, 32, %s219_s1, [#allocation4]  }
  0xe0   :  { %178 = dma.done.wait [#allocation4], 32  }
  0xe1   :  { %179 = vsyncadd [#allocation4], 4294967264 }
  0xe2   :  { %82 = vsyncpa [#allocation3], 1 }
  0xe3   :  { %83 = vsyncpa [#allocation4], 1 }

</bundles_post_ra>
